<compile_context>
chip_gen: v7x
topology: tpu7x:2x2x1
jax: 0.10.0
libtpu: 0.0.40
codegen_flags: <defaults>
</compile_context>

<pallas_src>
import functools

import jax
import jax.numpy as jnp
from jax.experimental import pallas as pl
from jax.experimental.pallas import tpu as pltpu


def _coupling_kernel(
    x_ref, mask_ref,
    w1_ref, b1_ref,        # fused layer 1:            (D, 2H), (1, 2H)
    w2_ref, b2_ref,        # block-diag fused layer 2: (2H, 2H), (1, 2H)
    w3_ref, b3_ref,        # block-diag fused layer 3: (2H, 2D), (1, 2D)
    y_ref, logdet_ref,
    *, in_dim: int,
):
    x = x_ref[...]                        # (TB, D)
    mask = mask_ref[...]                  # (1, D), broadcasts over the tile
    inv_mask = 1.0 - mask
    x_masked = x * mask

    # ---- Fused 3-layer MLP: s- and t-nets share every MXU pass ----
    h = jnp.dot(x_masked, w1_ref[...], preferred_element_type=jnp.float32)
    h = jnp.maximum(h + b1_ref[...], 0.0)                       # (TB, 2H)
    h = jnp.dot(h, w2_ref[...], preferred_element_type=jnp.float32)
    h = jnp.maximum(h + b2_ref[...], 0.0)                       # (TB, 2H)
    st = jnp.dot(h, w3_ref[...], preferred_element_type=jnp.float32)
    st = st + b3_ref[...]                                       # (TB, 2D)

    s_raw = st[:, :in_dim]                # s-net output (static lane slice)
    t = st[:, in_dim:]                    # t-net output

    # ---- Affine coupling epilogue ----
    # mask is binary, so clip(s * inv_mask) is already zero on the kept dims:
    # logdet = sum(s), and t only needs masking once (inside y).
    s = jnp.clip(s_raw * inv_mask, -5.0, 5.0)
    y_ref[...] = x_masked + inv_mask * (x * jnp.exp(s) + t)
    logdet_ref[...] = jnp.sum(s, axis=1, keepdims=True)


def _pick_batch_tile(B: int, cap: int = 1024) -> int:
    """Pick the batch tile: as large as possible (amortize ~0.35us/step grid
    overhead), capped so tiles comfortably fit VMEM, and split so large batches
    still get >=2 'parallel' grid steps (keeps both v7x TensorCores busy)."""
    if B <= cap:
        if B >= 512 and B % 16 == 0:
            return B // 2                 # two parallel steps for megacore
        return B                          # single step; whole batch resident
    tb = cap - (cap % 8)
    while tb >= 8:
        if B % tb == 0:
            return tb
        tb -= 8
    return B                              # no multiple-of-8 divisor: no tiling


def realnvp_coupling_forward(x, mask, params, *, batch_tile=None):
    """Forward pass of the RealNVP coupling layer.

    x:      (B, D) float32
    mask:   (D,)   float32 binary mask
    params: dict with s_w1 (D,H), s_b1 (H,), s_w2 (H,H), s_b2 (H,),
            s_w3 (H,D), s_b3 (D,), and the same for t_*.  Weights are stored
            pre-transposed ((in, out)) relative to torch.nn.Linear.
    Returns (y, logdet) with shapes (B, D) and (B,).
    """
    B, D = x.shape
    H = params["s_w1"].shape[1]
    TB = _pick_batch_tile(B) if batch_tile is None else batch_tile
    assert B % TB == 0, f"batch {B} must be divisible by batch tile {TB}"

    f32 = jnp.float32
    mask2d = mask.reshape(1, D).astype(f32)

    def row(v):   # (n,) -> (1, n) so it broadcasts over the batch tile
        return v.reshape(1, -1).astype(f32)

    # Layer 1: concat s- and t-net first Linear along the output axis.
    w1_cat = jnp.concatenate(
        [params["s_w1"].astype(f32), params["t_w1"].astype(f32)], axis=1)
    b1_cat = jnp.concatenate([row(params["s_b1"]), row(params["t_b1"])], axis=1)

    # Layers 2 / 3: block-diagonal so one wide MXU pass serves both nets.
    z_hh = jnp.zeros((H, H), f32)
    w2_blk = jnp.concatenate(
        [jnp.concatenate([params["s_w2"].astype(f32), z_hh], axis=1),
         jnp.concatenate([z_hh, params["t_w2"].astype(f32)], axis=1)], axis=0)
    b2_cat = jnp.concatenate([row(params["s_b2"]), row(params["t_b2"])], axis=1)

    z_hd = jnp.zeros((H, D), f32)
    w3_blk = jnp.concatenate(
        [jnp.concatenate([params["s_w3"].astype(f32), z_hd], axis=1),
         jnp.concatenate([z_hd, params["t_w3"].astype(f32)], axis=1)], axis=0)
    b3_cat = jnp.concatenate([row(params["s_b3"]), row(params["t_b3"])], axis=1)

    def const_spec(shape):
        # Grid-invariant operand: constant index_map + single buffering
        # (double-buffering would only double its VMEM footprint).
        return pl.BlockSpec(shape, lambda i: (0, 0),
                            pipeline_mode=pl.Buffered(1))

    in_specs = [
        pl.BlockSpec((TB, D), lambda i: (i, 0)),              # x (pipelined)
        const_spec((1, D)),                                   # mask
        const_spec((D, 2 * H)), const_spec((1, 2 * H)),       # fused layer 1
        const_spec((2 * H, 2 * H)), const_spec((1, 2 * H)),   # fused layer 2
        const_spec((2 * H, 2 * D)), const_spec((1, 2 * D)),   # fused layer 3
    ]
    out_specs = [
        pl.BlockSpec((TB, D), lambda i: (i, 0)),              # y
        pl.BlockSpec((TB, 1), lambda i: (i, 0)),              # logdet (2-D)
    ]

    kernel = functools.partial(_coupling_kernel, in_dim=D)

    y, logdet = pl.pallas_call(
        kernel,
        out_shape=(
            jax.ShapeDtypeStruct((B, D), f32),
            jax.ShapeDtypeStruct((B, 1), f32),
        ),
        grid_spec=pltpu.PrefetchScalarGridSpec(
            num_scalar_prefetch=0,
            grid=(B // TB,),
            in_specs=in_specs,
            out_specs=out_specs,
        ),
        compiler_params=pltpu.CompilerParams(
            dimension_semantics=("parallel",),
            vmem_limit_bytes=32 * 1024 * 1024,
        ),
    )(
        x.astype(f32), mask2d,
        w1_cat, b1_cat,
        w2_blk, b2_cat,
        w3_blk, b3_cat,
    )
    return y, logdet[:, 0]


def _reference_forward(x, mask, params):
    """Pure-JAX reference matching the PyTorch forward exactly."""
    inv_mask = 1.0 - mask
    x_masked = x * mask

    def mlp(inp, p):
        h = jnp.maximum(inp @ params[p + "_w1"] + params[p + "_b1"], 0.0)
        h = jnp.maximum(h @ params[p + "_w2"] + params[p + "_b2"], 0.0)
        return h @ params[p + "_w3"] + params[p + "_b3"]

    s = jnp.clip(mlp(x_masked, "s") * inv_mask, -5.0, 5.0)
    t = mlp(x_masked, "t") * inv_mask
    y = x_masked + inv_mask * (x * jnp.exp(s) + t)
    logdet = jnp.sum(s * inv_mask, axis=1)
    return y, logdet


def _init_params(key, in_dim, hidden_dim):
    # Deterministic synthetic init. NOTE: the PyTorch module zero-inits the
    # final Linear of each net; we use small nonzero values here so the
    # exp/clamp path of the kernel is actually exercised.
    ks = jax.random.split(key, 12)

    def w(k, shape, scale):
        return (scale * jax.random.normal(k, shape)).astype(jnp.float32)

    p = {}
    for i, pre in enumerate(("s", "t")):
        o = 6 * i
        p[pre + "_w1"] = w(ks[o + 0], (in_dim, hidden_dim), 0.5)
        p[pre + "_b1"] = w(ks[o + 1], (hidden_dim,), 0.1)
        p[pre + "_w2"] = w(ks[o + 2], (hidden_dim, hidden_dim), 0.1)
        p[pre + "_b2"] = w(ks[o + 3], (hidden_dim,), 0.1)
        p[pre + "_w3"] = w(ks[o + 4], (hidden_dim, in_dim), 0.1)
        p[pre + "_b3"] = w(ks[o + 5], (in_dim,), 0.1)
    return p


if __name__ == "__main__":
    key = jax.random.PRNGKey(0)
    k_x, k_p, k_x2 = jax.random.split(key, 3)

    D, H = 2, 128                      # 2-D RealNVP, default hidden_dim=128
    mask = jnp.array([1.0, 0.0], dtype=jnp.float32)   # fixed mask: keep dim 0
    params = _init_params(k_p, D, H)

    # Small batch: whole batch is one tile -> single grid step.
    B = 16
    x = jax.random.normal(k_x, (B, D), dtype=jnp.float32)
    y, logdet = realnvp_coupling_forward(x, mask, params)
    jax.block_until_ready((y, logdet))
    y_ref, logdet_ref = _reference_forward(x, mask, params)
    assert y.shape == (B, D) and logdet.shape == (B,)
    assert jnp.allclose(y, y_ref, atol=1e-5, rtol=1e-5)
    assert jnp.allclose(logdet, logdet_ref, atol=1e-5, rtol=1e-5)

    # Larger batch exercises the multi-step "parallel" grid (2 x 256-row
    # tiles) with single-buffered grid-invariant weights.
    B2 = 512
    x2 = jax.random.normal(k_x2, (B2, D), dtype=jnp.float32)
    y2, logdet2 = realnvp_coupling_forward(x2, mask, params)
    jax.block_until_ready((y2, logdet2))
    y2_ref, logdet2_ref = _reference_forward(x2, mask, params)
    assert jnp.allclose(y2, y2_ref, atol=1e-5, rtol=1e-5)
    assert jnp.allclose(logdet2, logdet2_ref, atol=1e-5, rtol=1e-5)

    print("KERNEL_OK")
</pallas_src>

<mosaic_0001>
module attributes {stable_mosaic.version = 11 : i64} {
  func.func @_coupling_kernel(%arg0: i32, %arg1: memref<16x2xf32, #tpu.memory_space<vmem>>, %arg2: memref<1x2xf32, #tpu.memory_space<vmem>>, %arg3: memref<2x256xf32, #tpu.memory_space<vmem>>, %arg4: memref<1x256xf32, #tpu.memory_space<vmem>>, %arg5: memref<256x256xf32, #tpu.memory_space<vmem>>, %arg6: memref<1x256xf32, #tpu.memory_space<vmem>>, %arg7: memref<256x4xf32, #tpu.memory_space<vmem>>, %arg8: memref<1x4xf32, #tpu.memory_space<vmem>>, %arg9: memref<16x2xf32, #tpu.memory_space<vmem>>, %arg10: memref<16x1xf32, #tpu.memory_space<vmem>>) attributes {dimension_semantics = [#tpu.dimension_semantics<parallel>], iteration_bounds = array<i64: 1>, scalar_prefetch = 0 : i64, scratch_operands = 0 : i64, tpu.core_type = #tpu.core_type<tc>, window_params = [{transform_indices = @transform_0, window_bounds = array<i64: 16, 2>}, {pipeline_mode = #tpu.pipeline_mode<synchronous>, transform_indices = @transform_1, window_bounds = array<i64: 1, 2>}, {pipeline_mode = #tpu.pipeline_mode<synchronous>, transform_indices = @transform_2, window_bounds = array<i64: 2, 256>}, {pipeline_mode = #tpu.pipeline_mode<synchronous>, transform_indices = @transform_3, window_bounds = array<i64: 1, 256>}, {pipeline_mode = #tpu.pipeline_mode<synchronous>, transform_indices = @transform_4, window_bounds = array<i64: 256, 256>}, {pipeline_mode = #tpu.pipeline_mode<synchronous>, transform_indices = @transform_5, window_bounds = array<i64: 1, 256>}, {pipeline_mode = #tpu.pipeline_mode<synchronous>, transform_indices = @transform_6, window_bounds = array<i64: 256, 4>}, {pipeline_mode = #tpu.pipeline_mode<synchronous>, transform_indices = @transform_7, window_bounds = array<i64: 1, 4>}, {transform_indices = @transform_8, window_bounds = array<i64: 16, 2>}, {transform_indices = @transform_9, window_bounds = array<i64: 16, 1>}]} {
    %c0 = arith.constant 0 : index
    %c0_0 = arith.constant 0 : index
    %0 = vector.load %arg1[%c0, %c0_0] : memref<16x2xf32, #tpu.memory_space<vmem>>, vector<16x2xf32>
    %c0_1 = arith.constant 0 : index
    %c0_2 = arith.constant 0 : index
    %1 = vector.load %arg2[%c0_1, %c0_2] : memref<1x2xf32, #tpu.memory_space<vmem>>, vector<1x2xf32>
    %cst = arith.constant 1.000000e+00 : f32
    %2 = vector.broadcast %cst : f32 to vector<1x2xf32>
    %3 = arith.subf %2, %1 : vector<1x2xf32>
    %4 = vector.broadcast %1 : vector<1x2xf32> to vector<16x2xf32>
    %5 = arith.mulf %0, %4 : vector<16x2xf32>
    %c0_3 = arith.constant 0 : index
    %c0_4 = arith.constant 0 : index
    %6 = vector.load %arg3[%c0_3, %c0_4] : memref<2x256xf32, #tpu.memory_space<vmem>>, vector<2x256xf32>
    %cst_5 = arith.constant dense<0.000000e+00> : vector<16x256xf32>
    %7 = tpu.matmul %5, %6, %cst_5 {dimension_numbers = #tpu.dot_dimension_numbers<[1], [0], [0], [1], [0, 0, 1, 1], [], []>} : vector<16x2xf32>, vector<2x256xf32>, vector<16x256xf32> -> vector<16x256xf32>
    %c0_6 = arith.constant 0 : index
    %c0_7 = arith.constant 0 : index
    %8 = vector.load %arg4[%c0_6, %c0_7] : memref<1x256xf32, #tpu.memory_space<vmem>>, vector<1x256xf32>
    %9 = vector.broadcast %8 : vector<1x256xf32> to vector<16x256xf32>
    %10 = arith.addf %7, %9 : vector<16x256xf32>
    %cst_8 = arith.constant 0.000000e+00 : f32
    %11 = vector.broadcast %cst_8 : f32 to vector<16x256xf32>
    %12 = arith.maximumf %10, %11 : vector<16x256xf32>
    %c0_9 = arith.constant 0 : index
    %c0_10 = arith.constant 0 : index
    %13 = vector.load %arg5[%c0_9, %c0_10] : memref<256x256xf32, #tpu.memory_space<vmem>>, vector<256x256xf32>
    %cst_11 = arith.constant dense<0.000000e+00> : vector<16x256xf32>
    %14 = tpu.matmul %12, %13, %cst_11 {dimension_numbers = #tpu.dot_dimension_numbers<[1], [0], [0], [1], [0, 0, 1, 1], [], []>} : vector<16x256xf32>, vector<256x256xf32>, vector<16x256xf32> -> vector<16x256xf32>
    %c0_12 = arith.constant 0 : index
    %c0_13 = arith.constant 0 : index
    %15 = vector.load %arg6[%c0_12, %c0_13] : memref<1x256xf32, #tpu.memory_space<vmem>>, vector<1x256xf32>
    %16 = vector.broadcast %15 : vector<1x256xf32> to vector<16x256xf32>
    %17 = arith.addf %14, %16 : vector<16x256xf32>
    %cst_14 = arith.constant 0.000000e+00 : f32
    %18 = vector.broadcast %cst_14 : f32 to vector<16x256xf32>
    %19 = arith.maximumf %17, %18 : vector<16x256xf32>
    %c0_15 = arith.constant 0 : index
    %c0_16 = arith.constant 0 : index
    %20 = vector.load %arg7[%c0_15, %c0_16] : memref<256x4xf32, #tpu.memory_space<vmem>>, vector<256x4xf32>
    %cst_17 = arith.constant dense<0.000000e+00> : vector<16x4xf32>
    %21 = tpu.matmul %19, %20, %cst_17 {dimension_numbers = #tpu.dot_dimension_numbers<[1], [0], [0], [1], [0, 0, 1, 1], [], []>} : vector<16x256xf32>, vector<256x4xf32>, vector<16x4xf32> -> vector<16x4xf32>
    %c0_18 = arith.constant 0 : index
    %c0_19 = arith.constant 0 : index
    %22 = vector.load %arg8[%c0_18, %c0_19] : memref<1x4xf32, #tpu.memory_space<vmem>>, vector<1x4xf32>
    %23 = vector.broadcast %22 : vector<1x4xf32> to vector<16x4xf32>
    %24 = arith.addf %21, %23 : vector<16x4xf32>
    %25 = vector.extract_strided_slice %24 {offsets = [0, 0], sizes = [16, 2], strides = [1, 1]} : vector<16x4xf32> to vector<16x2xf32>
    %26 = vector.extract_strided_slice %24 {offsets = [0, 2], sizes = [16, 2], strides = [1, 1]} : vector<16x4xf32> to vector<16x2xf32>
    %27 = vector.broadcast %3 : vector<1x2xf32> to vector<16x2xf32>
    %28 = arith.mulf %25, %27 : vector<16x2xf32>
    %cst_20 = arith.constant -5.000000e+00 : f32
    %cst_21 = arith.constant 5.000000e+00 : f32
    %29 = vector.broadcast %cst_20 : f32 to vector<16x2xf32>
    %30 = arith.maximumf %29, %28 : vector<16x2xf32>
    %31 = vector.broadcast %cst_21 : f32 to vector<16x2xf32>
    %32 = arith.minimumf %31, %30 : vector<16x2xf32>
    %33 = math.exp %32 : vector<16x2xf32>
    %34 = arith.mulf %0, %33 : vector<16x2xf32>
    %35 = arith.addf %34, %26 : vector<16x2xf32>
    %36 = vector.broadcast %3 : vector<1x2xf32> to vector<16x2xf32>
    %37 = arith.mulf %36, %35 : vector<16x2xf32>
    %38 = arith.addf %5, %37 : vector<16x2xf32>
    %c0_22 = arith.constant 0 : index
    %c0_23 = arith.constant 0 : index
    %39 = vector.load %arg9[%c0_22, %c0_23] : memref<16x2xf32, #tpu.memory_space<vmem>>, vector<16x2xf32>
    tpu.vector_store %arg9[%c0_22, %c0_23], %38 {strides = array<i32>} : memref<16x2xf32, #tpu.memory_space<vmem>>, vector<16x2xf32>,
    %cst_24 = arith.constant dense<0.000000e+00> : vector<16xf32>
    %40 = vector.multi_reduction <add>, %32, %cst_24 [1] : vector<16x2xf32> to vector<16xf32>
    %41 = vector.shape_cast %40 : vector<16xf32> to vector<16x1xf32>
    %c0_25 = arith.constant 0 : index
    %c0_26 = arith.constant 0 : index
    %42 = vector.load %arg10[%c0_25, %c0_26] : memref<16x1xf32, #tpu.memory_space<vmem>>, vector<16x1xf32>
    tpu.vector_store %arg10[%c0_25, %c0_26], %41 {strides = array<i32>} : memref<16x1xf32, #tpu.memory_space<vmem>>, vector<16x1xf32>,
    return
  }
  func.func @transform_0(%arg0: i32) -> (i32, i32) {
    %c0_i32 = arith.constant 0 : i32
    %c0_i32_0 = arith.constant 0 : i32
    return %arg0, %c0_i32 : i32, i32
  }
  func.func @transform_1(%arg0: i32) -> (i32, i32) {
    %c0_i32 = arith.constant 0 : i32
    %c0_i32_0 = arith.constant 0 : i32
    %c0_i32_1 = arith.constant 0 : i32
    return %c0_i32, %c0_i32_0 : i32, i32
  }
  func.func @transform_2(%arg0: i32) -> (i32, i32) {
    %c0_i32 = arith.constant 0 : i32
    %c0_i32_0 = arith.constant 0 : i32
    %c0_i32_1 = arith.constant 0 : i32
    return %c0_i32, %c0_i32_0 : i32, i32
  }
  func.func @transform_3(%arg0: i32) -> (i32, i32) {
    %c0_i32 = arith.constant 0 : i32
    %c0_i32_0 = arith.constant 0 : i32
    %c0_i32_1 = arith.constant 0 : i32
    return %c0_i32, %c0_i32_0 : i32, i32
  }
  func.func @transform_4(%arg0: i32) -> (i32, i32) {
    %c0_i32 = arith.constant 0 : i32
    %c0_i32_0 = arith.constant 0 : i32
    %c0_i32_1 = arith.constant 0 : i32
    return %c0_i32, %c0_i32_0 : i32, i32
  }
  func.func @transform_5(%arg0: i32) -> (i32, i32) {
    %c0_i32 = arith.constant 0 : i32
    %c0_i32_0 = arith.constant 0 : i32
    %c0_i32_1 = arith.constant 0 : i32
    return %c0_i32, %c0_i32_0 : i32, i32
  }
  func.func @transform_6(%arg0: i32) -> (i32, i32) {
    %c0_i32 = arith.constant 0 : i32
    %c0_i32_0 = arith.constant 0 : i32
    %c0_i32_1 = arith.constant 0 : i32
    return %c0_i32, %c0_i32_0 : i32, i32
  }
  func.func @transform_7(%arg0: i32) -> (i32, i32) {
    %c0_i32 = arith.constant 0 : i32
    %c0_i32_0 = arith.constant 0 : i32
    %c0_i32_1 = arith.constant 0 : i32
    return %c0_i32, %c0_i32_0 : i32, i32
  }
  func.func @transform_8(%arg0: i32) -> (i32, i32) {
    %c0_i32 = arith.constant 0 : i32
    %c0_i32_0 = arith.constant 0 : i32
    return %arg0, %c0_i32 : i32, i32
  }
  func.func @transform_9(%arg0: i32) -> (i32, i32) {
    %c0_i32 = arith.constant 0 : i32
    %c0_i32_0 = arith.constant 0 : i32
    return %arg0, %c0_i32 : i32, i32
  }
}

</mosaic_0001>

<bundles_post_ra>
// kernel: tpu_custom_call.1
= control target key start
LH: loop header
LB: loop body
LE: loop exit
PB: predicated region body
PF: predicated region fallthrough
CT: control target
= control target key end

     0   :  { %15 = vsyncpa [#allocation3], 0  ;;  %s670_s30 = smov [#allocation2]   ;;  %s904_s0 = inlined_call_operand.vmem [shape: f32[16,2], index: 0, kind: input, shape index: {}]   ;;  %s905_s1 = inlined_call_operand.vmem [shape: f32[1,2], index: 1, kind: input, shape index: {}]   ;;  %s906_s2 = inlined_call_operand.vmem [shape: f32[2,256], index: 2, kind: input, shape index: {}]   ;;  %s907_s3 = inlined_call_operand.vmem [shape: f32[1,256], index: 3, kind: input, shape index: {}]   ;;  %s908_s4 = inlined_call_operand.hbm [shape: f32[256,256], index: 4, kind: input, shape index: {}]   ;;  %s909_s5 = inlined_call_operand.vmem [shape: f32[1,256], index: 5, kind: input, shape index: {}]   ;;  %s910_s6 = inlined_call_operand.vmem [shape: f32[256,4], index: 6, kind: input, shape index: {}]   ;;  %s911_s7 = inlined_call_operand.vmem [shape: f32[1,4], index: 7, kind: input, shape index: {}]   ;;  %s912_s8 = inlined_call_operand.vmem [shape: f32[16,2], index: 8, kind: output, shape index: {0}]   ;;  %s913_s9 = inlined_call_operand.vmem [shape: f32[16,1], index: 9, kind: output, shape index: {1}]  }
   0x1   :  { %s29_s10 = sshll.u32 %s670_s30, 4  ;;  %s646_s13 = scalar_lea.hbm %s908_s4, 8192  ;;  %s30_s10 = int_to_ptr.vmem [resolvable:$true] %s29_s10 }
   0x2   :  { %p647_p0 = scmp.ne.s32.totalorder %s908_s4, %s646_s13  ;;  %p650_p1 = scmp.lt.u32.totalorder %s646_s13, %s908_s4 }
   0x4   :  { %p652_p2 = pnand %p650_p1, %p647_p0 }
   0x6   :  { %655 = shalt.err (!%p652_p2)
}
   0x7   :  { %s656_s18 = scalar_lea.vmem %s30_s10, 8192  ;;  %p661_p4 = scmp.lt.s32.totalorder %s30_s10, %s30_s10 }
   0x8   :  { %p657_p3 = scmp.ne.s32.totalorder %s30_s10, %s656_s18  ;;  %p662_p5 = scmp.lt.s32.totalorder %s656_s18, %s656_s18 }
   0xa   :  { %p663_p6 = por %p662_p5, %p661_p4 }
   0xc   :  { %p664_p7 = pnand %p663_p6, %p657_p3 }
   0xe   :  { %667 = shalt.err (!%p664_p7)
}
   0xf   :  { %s671_s19 = smov 256   ;;  %s672_s20 = smov 16  }
  0x10   :  { %35 = dma.hbm_to_vmem [thread:$0]  %s908_s4, 8192, %s30_s10, [#allocation3], %s671_s19, %s671_s19, %s672_s20  }
  0x11   :  { %668 = dma.done.wait [#allocation3], 8192  }
  0x12   :  { %669 = vsyncadd [#allocation3], 4294959104  ;;  %v50_v0 = vlaneseq  ;;  %v673_v1 = vmov 0.0   ;;  %vm86_vm0 = vcmask 1041408   ;;  %v748_v5 = vld [vmem:[%s904_s0] sm:$0xff]  ;;  %v758_v8 = vld [vmem:[%s904_s0 + $0x8] sm:$0xff] }
  0x13   :  { %155 = vmatprep.mubr.f32.mxu0 %v673_v1  ;;  %v495_v4 = vld.sshfl [vmem:[%s906_s2] sm:$0x33 pattern:$0x76325410]  ;;  %v173_v9 = vld [vmem:[#allocation2 + $0x8] sm:$0xff]  ;;  %v175_v10 = vld [vmem:[#allocation2 + $0x18] sm:$0xff] }
  0x14   :  { %v737_v2 = vshrl.u32 %v50_v0, 7  ;;  %v78_v6 = vcombine.high %v495_v4, %v495_v4  ;;  %v753_v7 = vld [vmem:[%s905_s1] sm:$0x1]  ;;  %v541_v12 = vpack.c.bf16 %v175_v10, %v173_v9  ;;  %v174_v14 = vld [vmem:[#allocation2 + $0x10] sm:$0xff]  ;;  %v177_v15 = vld [vmem:[#allocation2 + $0x28] sm:$0xff]  ;;  %vm79_vm1 = vcmask 15360  }
  0x15   :  { %v172_v13 = vld [vmem:[#allocation2] sm:$0xff]  ;;  %v179_v17 = vld [vmem:[#allocation2 + $0x38] sm:$0xff]  ;;  %v178_v19 = vld [vmem:[#allocation2 + $0x30] sm:$0xff]  ;;  %s674_s23 = smov 126   ;;  %vm483_vm2 = vcmask 7168  }
  0x16   :  { %v740_v3 = vsub.s32 0, %v737_v2  ;;  %496 = vmatprep.subr.msk.mxu0 %vm86_vm0, %v78_v6  ;;  %v543_v16 = vpack.c.bf16 %v174_v14, %v172_v13  ;;  %v176_v18 = vld [vmem:[#allocation2 + $0x20] sm:$0xff]  ;;  %542 = vmatprep.subr.bf16.mxu1 %v541_v12  ;;  %v545_v21 = vpack.c.bf16 %v179_v17, %v177_v15  ;;  %v181_v22 = vld [vmem:[#allocation2 + $0x48] sm:$0xff]  ;;  %v183_v23 = vld [vmem:[#allocation2 + $0x58] sm:$0xff] }
  0x17   :  { %497 = vmatpush1.msk.msra.mxu0 %vm86_vm0, %v495_v4  ;;  %v547_v24 = vpack.c.bf16 %v178_v19, %v176_v18  ;;  %v549_v26 = vpack.c.bf16 %v183_v23, %v181_v22  ;;  %v180_v27 = vld [vmem:[#allocation2 + $0x40] sm:$0xff]  ;;  %v182_v28 = vld [vmem:[#allocation2 + $0x50] sm:$0xff]  ;;  %v185_v29 = vld [vmem:[#allocation2 + $0x68] sm:$0xff] }
  0x18   :  { %v53_v11 = vrot.slane %v753_v7, %v740_v3  ;;  %544 = vmatpush1.bf16.msra.mxu1 %v543_v16  ;;  %v187_v30 = vld [vmem:[#allocation2 + $0x78] sm:$0xff]  ;;  %v551_v31 = vpack.c.bf16 %v182_v28, %v180_v27  ;;  %v184_v33 = vld [vmem:[#allocation2 + $0x60] sm:$0xff]  ;;  %v186_v34 = vld [vmem:[#allocation2 + $0x70] sm:$0xff] }
  0x19   :  { %546 = vmatprep.subr.bf16.mxu1 %v545_v21  ;;  %v553_v32 = vpack.c.bf16 %v187_v30, %v185_v29  ;;  %v189_v35 = vld [vmem:[#allocation2 + $0x88] sm:$0xff]  ;;  %v191_v36 = vld [vmem:[#allocation2 + $0x98] sm:$0xff]  ;;  %v555_v37 = vpack.c.bf16 %v186_v34, %v184_v33  ;;  %v188_v39 = vld [vmem:[#allocation2 + $0x80] sm:$0xff] }
  0x1a   :  { %v765_v20 = vmul.f32 %v53_v11, %v748_v5  ;;  %v770_v25 = vmul.f32 %v53_v11, %v758_v8  ;;  %v557_v38 = vpack.c.bf16 %v191_v36, %v189_v35  ;;  %v190_v40 = vld [vmem:[#allocation2 + $0x90] sm:$0xff]  ;;  %v193_v41 = vld [vmem:[#allocation2 + $0xa8] sm:$0xff]  ;;  %v195_v42 = vld [vmem:[#allocation2 + $0xb8] sm:$0xff] }
  0x1b   :  { %v559_v43 = vpack.c.bf16 %v190_v40, %v188_v39  ;;  %v561_v44 = vpack.c.bf16 %v195_v42, %v193_v41  ;;  %v192_v45 = vld [vmem:[#allocation2 + $0xa0] sm:$0xff]  ;;  %v194_v46 = vld [vmem:[#allocation2 + $0xb0] sm:$0xff]  ;;  %v197_v47 = vld [vmem:[#allocation2 + $0xc8] sm:$0xff] }
  0x1c   :  { %498 = vmatmul.mubr.msk.f32.vlgmr.msra.gmra.mrb[0].mxu0 %vm79_vm1, %v765_v20  ;;  %548 = vmatpush1.bf16.msra.mxu1 %v547_v24  ;;  %v199_v48 = vld [vmem:[#allocation2 + $0xd8] sm:$0xff]  ;;  %v563_v49 = vpack.c.bf16 %v194_v46, %v192_v45  ;;  %v196_v51 = vld [vmem:[#allocation2 + $0xc0] sm:$0xff]  ;;  %v198_v52 = vld [vmem:[#allocation2 + $0xd0] sm:$0xff] }
  0x1d   :  { %161 = vmatprep.mubr.f32.mxu0 %v673_v1  ;;  %550 = vmatprep.subr.bf16.mxu1 %v549_v26  ;;  %v565_v50 = vpack.c.bf16 %v199_v48, %v197_v47  ;;  %v201_v53 = vld [vmem:[#allocation2 + $0xe8] sm:$0xff]  ;;  %v203_v54 = vld [vmem:[#allocation2 + $0xf8] sm:$0xff]  ;;  %v567_v55 = vpack.c.bf16 %v198_v52, %v196_v51  ;;  %v200_v57 = vld [vmem:[#allocation2 + $0xe0] sm:$0xff] }
  0x1e   :  { %v569_v56 = vpack.c.bf16 %v203_v54, %v201_v53  ;;  %v202_v58 = vld [vmem:[#allocation2 + $0xf0] sm:$0xff]  ;;  %v205_v59 = vld [vmem:[#allocation2 + $0x108] sm:$0xff]  ;;  %v207_v60 = vld [vmem:[#allocation2 + $0x118] sm:$0xff] }
  0x1f   :  { %v571_v61 = vpack.c.bf16 %v202_v58, %v200_v57  ;;  %v573_v62 = vpack.c.bf16 %v207_v60, %v205_v59  ;;  %v204_v63 = vld [vmem:[#allocation2 + $0x100] sm:$0xff]  ;;  %v206_v0 = vld [vmem:[#allocation2 + $0x110] sm:$0xff]  ;;  %v209_v1 = vld [vmem:[#allocation2 + $0x128] sm:$0xff] }
  0x20   :  { %499 = vmatmul.mubr.msk.f32.gmra.mrb[2].mxu0 %vm79_vm1, %v770_v25  ;;  %552 = vmatpush1.bf16.msra.mxu1 %v551_v31  ;;  %v211_v4 = vld [vmem:[#allocation2 + $0x138] sm:$0xff]  ;;  %v575_v6 = vpack.c.bf16 %v206_v0, %v204_v63  ;;  %v208_v10 = vld [vmem:[#allocation2 + $0x120] sm:$0xff]  ;;  %v210_v11 = vld [vmem:[#allocation2 + $0x130] sm:$0xff] }
  0x21   :  { %554 = vmatprep.subr.bf16.mxu1 %v553_v32  ;;  %v577_v9 = vpack.c.bf16 %v211_v4, %v209_v1  ;;  %v213_v12 = vld [vmem:[#allocation2 + $0x148] sm:$0xff]  ;;  %v215_v13 = vld [vmem:[#allocation2 + $0x158] sm:$0xff]  ;;  %v579_v14 = vpack.c.bf16 %v210_v11, %v208_v10  ;;  %v212_v16 = vld [vmem:[#allocation2 + $0x140] sm:$0xff] }
  0x22   :  { %v581_v15 = vpack.c.bf16 %v215_v13, %v213_v12  ;;  %v214_v17 = vld [vmem:[#allocation2 + $0x150] sm:$0xff]  ;;  %v217_v18 = vld [vmem:[#allocation2 + $0x168] sm:$0xff]  ;;  %v219_v19 = vld [vmem:[#allocation2 + $0x178] sm:$0xff] }
  0x23   :  { %v583_v21 = vpack.c.bf16 %v214_v17, %v212_v16  ;;  %v585_v22 = vpack.c.bf16 %v219_v19, %v217_v18  ;;  %v216_v23 = vld [vmem:[#allocation2 + $0x160] sm:$0xff]  ;;  %v218_v24 = vld [vmem:[#allocation2 + $0x170] sm:$0xff]  ;;  %v221_v26 = vld [vmem:[#allocation2 + $0x188] sm:$0xff] }
  0x24   :  { %556 = vmatpush1.bf16.msra.mxu1 %v555_v37  ;;  %v223_v27 = vld [vmem:[#allocation2 + $0x198] sm:$0xff]  ;;  %v587_v28 = vpack.c.bf16 %v218_v24, %v216_v23  ;;  %v220_v30 = vld [vmem:[#allocation2 + $0x180] sm:$0xff]  ;;  %v222_v31 = vld [vmem:[#allocation2 + $0x190] sm:$0xff] }
  0x25   :  { %558 = vmatprep.subr.bf16.mxu1 %v557_v38  ;;  %v589_v29 = vpack.c.bf16 %v223_v27, %v221_v26  ;;  %v225_v32 = vld [vmem:[#allocation2 + $0x1a8] sm:$0xff]  ;;  %v227_v33 = vld [vmem:[#allocation2 + $0x1b8] sm:$0xff]  ;;  %v591_v34 = vpack.c.bf16 %v222_v31, %v220_v30  ;;  %v224_v36 = vld [vmem:[#allocation2 + $0x1a0] sm:$0xff] }
  0x26   :  { %v593_v35 = vpack.c.bf16 %v227_v33, %v225_v32  ;;  %v226_v37 = vld [vmem:[#allocation2 + $0x1b0] sm:$0xff]  ;;  %v229_v38 = vld [vmem:[#allocation2 + $0x1c8] sm:$0xff]  ;;  %v231_v39 = vld [vmem:[#allocation2 + $0x1d8] sm:$0xff] }
  0x27   :  { %v595_v40 = vpack.c.bf16 %v226_v37, %v224_v36  ;;  %v597_v41 = vpack.c.bf16 %v231_v39, %v229_v38  ;;  %v228_v42 = vld [vmem:[#allocation2 + $0x1c0] sm:$0xff]  ;;  %v233_v45 = vld [vmem:[#allocation2 + $0x1e8] sm:$0xff]  ;;  %v235_v46 = vld [vmem:[#allocation2 + $0x1f8] sm:$0xff] }
  0x28   :  { %560 = vmatpush1.bf16.msra.mxu1 %v559_v43  ;;  %v230_v43 = vld [vmem:[#allocation2 + $0x1d0] sm:$0xff]  ;;  %v601_v47 = vpack.c.bf16 %v235_v46, %v233_v45  ;;  %v232_v48 = vld [vmem:[#allocation2 + $0x1e0] sm:$0xff]  ;;  %v346_v52 = vld [vmem:[%s910_s6 + $0x88] sm:$0xff] }
  0x29   :  { %562 = vmatprep.subr.bf16.mxu1 %v561_v44  ;;  %v599_v44 = vpack.c.bf16 %v230_v43, %v228_v42  ;;  %v345_v51 = vld [vmem:[%s910_s6 + $0x80] sm:$0xff]  ;;  %v348_v57 = vld [vmem:[%s910_s6 + $0x98] sm:$0xff]  ;;  %v331_v60 = vld [vmem:[%s910_s6 + $0x10] sm:$0xff] }
  0x2a   :  { %v329_v53 = vld [vmem:[%s910_s6] sm:$0xff]  ;;  %v605_v54 = vpack.c.bf16 %v346_v52, %v345_v51  ;;  %v350_v63 = vld [vmem:[%s910_s6 + $0xa8] sm:$0xff]  ;;  %v352_v10 = vld [vmem:[%s910_s6 + $0xb8] sm:$0xff] }
  0x2b   :  { %v333_v4 = vld [vmem:[%s910_s6 + $0x20] sm:$0xff]  ;;  %v335_v13 = vld [vmem:[%s910_s6 + $0x30] sm:$0xff]  ;;  %v354_v16 = vld [vmem:[%s910_s6 + $0xc8] sm:$0xff] }
  0x2c   :  { %564 = vmatpush1.bf16.msra.mxu1 %v563_v49  ;;  %v234_v49 = vld [vmem:[#allocation2 + $0x1f0] sm:$0xff]  ;;  %606 = vmatprep.subr.bf16.mxu0 %v605_v54  ;;  %v337_v19 = vld [vmem:[%s910_s6 + $0x40] sm:$0xff]  ;;  %v356_v23 = vld [vmem:[%s910_s6 + $0xd8] sm:$0xff] }
  0x2d   :  { %566 = vmatprep.subr.bf16.mxu1 %v565_v50  ;;  %v603_v50 = vpack.c.bf16 %v234_v49, %v232_v48  ;;  %v339_v27 = vld [vmem:[%s910_s6 + $0x50] sm:$0xff]  ;;  %v358_v30 = vld [vmem:[%s910_s6 + $0xe8] sm:$0xff]  ;;  %v58_v33 = vld [vmem:[%s907_s3] sm:$0x3] }
  0x2e   :  { %v342_v49 = vld [vmem:[%s910_s6 + $0x68] sm:$0xff]  ;;  %v359_v51 = vld [vmem:[%s910_s6 + $0xf0] sm:$0xff]  ;;  %v360_v52 = vld [vmem:[%s910_s6 + $0xf8] sm:$0xff] }
  0x2f   :  { %v343_v54 = vld [vmem:[%s910_s6 + $0x70] sm:$0xff] }
  0x30   :  { %568 = vmatpush1.bf16.msra.mxu1 %v567_v55  ;;  %v330_v55 = vld [vmem:[%s910_s6 + $0x8] sm:$0xff] }
  0x31   :  { %570 = vmatprep.subr.bf16.mxu1 %v569_v56  ;;  %v347_v56 = vld [vmem:[%s910_s6 + $0x90] sm:$0xff]  ;;  %v607_v58 = vpack.c.bf16 %v330_v55, %v329_v53  ;;  %v633_v53 = vpack.c.bf16 %v360_v52, %v359_v51  ;;  %v344_v55 = vld [vmem:[%s910_s6 + $0x78] sm:$0xff] }
  0x32   :  { %v609_v59 = vpack.c.bf16 %v348_v57, %v347_v56  ;;  %v635_v56 = vpack.c.bf16 %v344_v55, %v343_v54  ;;  %v236_v57 = vld [vmem:[%s909_s5] sm:$0x3] }
  0x33   :  { %608 = vmatpush3.bf16.msra.mxu0 %v607_v58  ;;  %v241_v58 = vrot.slane %v236_v57, %v740_v3 }
  0x34   :  { %572 = vmatpush1.bf16.msra.mxu1 %v571_v61  ;;  %v332_v61 = vld [vmem:[%s910_s6 + $0x18] sm:$0xff]  ;;  %610 = vmatprep.subr.bf16.mxu0 %v609_v59 }
  0x35   :  { %574 = vmatprep.subr.bf16.mxu1 %v573_v62  ;;  %v349_v62 = vld [vmem:[%s910_s6 + $0xa0] sm:$0xff]  ;;  %v611_v0 = vpack.c.bf16 %v332_v61, %v331_v60 }
  0x36   :  { %v613_v1 = vpack.c.bf16 %v350_v63, %v349_v62 }
  0x37   :  { %612 = vmatpush3.bf16.msra.mxu0 %v611_v0 }
  0x38   :  { %576 = vmatpush1.bf16.msra.mxu1 %v575_v6  ;;  %v334_v6 = vld [vmem:[%s910_s6 + $0x28] sm:$0xff]  ;;  %614 = vmatprep.subr.bf16.mxu0 %v613_v1 }
  0x39   :  { %578 = vmatprep.subr.bf16.mxu1 %v577_v9  ;;  %v351_v9 = vld [vmem:[%s910_s6 + $0xb0] sm:$0xff]  ;;  %v615_v11 = vpack.c.bf16 %v334_v6, %v333_v4 }
  0x3a   :  { %v617_v12 = vpack.c.bf16 %v352_v10, %v351_v9 }
  0x3b   :  { %616 = vmatpush3.bf16.msra.mxu0 %v615_v11 }
  0x3c   :  { %580 = vmatpush1.bf16.msra.mxu1 %v579_v14  ;;  %v336_v14 = vld [vmem:[%s910_s6 + $0x38] sm:$0xff]  ;;  %618 = vmatprep.subr.bf16.mxu0 %v617_v12 }
  0x3d   :  { %582 = vmatprep.subr.bf16.mxu1 %v581_v15  ;;  %v353_v15 = vld [vmem:[%s910_s6 + $0xc0] sm:$0xff]  ;;  %v619_v17 = vpack.c.bf16 %v336_v14, %v335_v13  ;;  %v48_v13 = vsub.f32 1.0, %v753_v7 }
  0x3e   :  { %v621_v18 = vpack.c.bf16 %v354_v16, %v353_v15  ;;  %v500_v16 = vld [vmem:[%s911_s7] ss:$0 sm:$0xff] }
  0x3f   :  { %620 = vmatpush3.bf16.msra.mxu0 %v619_v17 }
  0x40   :  { %584 = vmatpush1.bf16.msra.mxu1 %v583_v21  ;;  %v338_v21 = vld [vmem:[%s910_s6 + $0x48] sm:$0xff]  ;;  %622 = vmatprep.subr.bf16.mxu0 %v621_v18  ;;  %v447_v18 = vrot.slane %v48_v13, %v740_v3 }
  0x41   :  { %586 = vmatprep.subr.bf16.mxu1 %v585_v22  ;;  %v355_v22 = vld [vmem:[%s910_s6 + $0xd0] sm:$0xff]  ;;  %v623_v24 = vpack.c.bf16 %v338_v21, %v337_v19 }
  0x42   :  { %v625_v26 = vpack.c.bf16 %v356_v23, %v355_v22 }
  0x43   :  { %624 = vmatpush3.bf16.msra.mxu0 %v623_v24 }
  0x44   :  { %588 = vmatpush1.bf16.msra.mxu1 %v587_v28  ;;  %v340_v28 = vld [vmem:[%s910_s6 + $0x58] sm:$0xff]  ;;  %626 = vmatprep.subr.bf16.mxu0 %v625_v26 }
  0x45   :  { %590 = vmatprep.subr.bf16.mxu1 %v589_v29  ;;  %v357_v29 = vld [vmem:[%s910_s6 + $0xe0] sm:$0xff]  ;;  %v627_v31 = vpack.c.bf16 %v340_v28, %v339_v27 }
  0x46   :  { %v629_v32 = vpack.c.bf16 %v358_v30, %v357_v29 }
  0x47   :  { %628 = vmatpush3.bf16.msra.mxu0 %v627_v31 }
  0x48   :  { %592 = vmatpush1.bf16.msra.mxu1 %v591_v34  ;;  %630 = vmatprep.subr.bf16.mxu0 %v629_v32  ;;  %v66_v34 = vsub.s32 1, %v737_v2  ;;  %v341_v2 = vld [vmem:[%s910_s6 + $0x60] sm:$0xff] }
  0x49   :  { %594 = vmatprep.subr.bf16.mxu1 %v593_v35  ;;  %v63_v35 = vrot.slane %v58_v33, %v740_v3 }
  0x4a   :  { %v67_v36 = vrot.slane %v58_v33, %v66_v34  ;;  %v245_v59 = vrot.slane %v236_v57, %v66_v34 }
  0x4c   :  { %596 = vmatpush1.bf16.msra.mxu1 %v595_v40 }
  0x4d   :  { %598 = vmatprep.subr.bf16.mxu1 %v597_v41 }
  0x50   :  { %600 = vmatpush1.bf16.msra.mxu1 %v599_v44 }
  0x51   :  { %602 = vmatprep.subr.bf16.mxu1 %v601_v47 }
  0x54   :  { %604 = vmatpush1.bf16.msra.mxu1 %v603_v50  ;;  %v631_v50 = vpack.c.bf16 %v342_v49, %v341_v2 }
  0x56   :  { %632 = vmatpush3.bf16.msra.mxu0 %v631_v50 }
  0x57   :  { %634 = vmatprep.subr.bf16.mxu0 %v633_v53 }
  0x5a   :  { %636 = vmatpush3.bf16.msra.mxu0 %v635_v56 }
  0xef   :  { %v157_v37 = vpop.f32.mrb[0].mxu0 }
  0xf0   :  { %v158_v38 = vadd.f32 %v157_v37, %v63_v35  ;;  %v159_v39 = vpop.f32.mrb[1].mxu0 }
  0xf1   :  { %v160_v40 = vadd.f32 %v159_v39, %v67_v36 }
  0xf2   :  { %v168_v43 = vmax.f32 %v158_v38, 0.0 }
  0xf3   :  { %v163_v41 = vpop.f32.mrb[2].mxu0  ;;  %v169_v42 = vmax.f32 %v160_v40, 0.0 }
  0xf4   :  { %v164_v44 = vadd.f32 %v163_v41, %v63_v35  ;;  %v165_v45 = vpop.f32.mrb[3].mxu0 }
  0xf5   :  { %v166_v46 = vadd.f32 %v165_v45, %v67_v36  ;;  %312 = vmatprep.mubr.f32.mxu1 %v169_v42 }
  0xf6   :  { %313 = vmatmul.mubr.f32.vlgmr.msra.gmra.mrb[0].mxu1 %v168_v43  ;;  %v170_v48 = vmax.f32 %v164_v44, 0.0 }
  0xf7   :  { %v171_v47 = vmax.f32 %v166_v46, 0.0 }
  0xf9   :  { %318 = vmatprep.mubr.f32.mxu1 %v171_v47 }
  0xfa   :  { %319 = vmatmul.mubr.f32.gmra.mrb[2].mxu1 %v170_v48 }
 0x1c9   :  { %v314_v60 = vpop.f32.mrb[0].mxu1 }
 0x1ca   :  { %v315_v61 = vadd.f32 %v314_v60, %v241_v58  ;;  %v316_v62 = vpop.f32.mrb[1].mxu1 }
 0x1cb   :  { %v317_v63 = vadd.f32 %v316_v62, %v245_v59 }
 0x1cc   :  { %v325_v4 = vmax.f32 %v315_v61, 0.0 }
 0x1cd   :  { %v326_v0 = vmax.f32 %v317_v63, 0.0  ;;  %v320_v1 = vpop.f32.mrb[2].mxu1 }
 0x1ce   :  { %v321_v6 = vadd.f32 %v320_v1, %v241_v58  ;;  %v322_v9 = vpop.f32.mrb[3].mxu1 }
 0x1cf   :  { %v323_v10 = vadd.f32 %v322_v9, %v245_v59  ;;  %432 = vmatprep.mubr.f32.mxu0 %v326_v0 }
 0x1d0   :  { %433 = vmatmul.mubr.f32.vlgmr.msra.gmra.mrb[4].mxu0 %v325_v4  ;;  %v327_v12 = vmax.f32 %v321_v6, 0.0 }
 0x1d1   :  { %v328_v11 = vmax.f32 %v323_v10, 0.0 }
 0x1d3   :  { %437 = vmatprep.mubr.f32.mxu0 %v328_v11 }
 0x1d4   :  { %438 = vmatmul.mubr.f32.gmra.mrb[6].mxu0 %v327_v12 }
 0x2a3   :  { %v535_v14 = vpop.f32.mrb[4].mxu0 }
 0x2a4   :  { %v536_v15 = vpop.f32.mrb[5].mxu0 }
 0x2a5   :  { %v537_v17 = vadd.f32 %v536_v15, %v535_v14 }
 0x2a7   :  { %v538_v19 = vpop.f32.mrb[6].mxu0  ;;  %v435_v21 = vadd.f32 %v537_v17, %v500_v16 }
 0x2a8   :  { %v539_v22 = vpop.f32.mrb[7].mxu0 }
 0x2a9   :  { %v540_v23 = vadd.f32 %v539_v22, %v538_v19  ;;  %463 = vrot.lane.b32.xlu1 %v435_v21, %s674_s23  ;;  %v449_v24 = vmul.f32 %v447_v18, %v435_v21 }
 0x2ab   :  { %v440_v26 = vadd.f32 %v540_v23, %v500_v16  ;;  %v501_v27 = vclamps-f32 %v449_v24, 5.0 }
 0x2ad   :  { %465 = vrot.lane.b32.xlu1 %v440_v26, %s674_s23  ;;  %v477_v7 = vsel %vm79_vm1, %v501_v27, 0.0  ;;  %v450_v28 = vmul.f32 %v447_v18, %v440_v26  ;;  %v455_v31 = vmul.f32 1.442695, %v501_v27 }
 0x2ae   :  { %478 = vadd.xlane.f32.xlu0 %v477_v7 }
 0x2af   :  { %v502_v29 = vclamps-f32 %v450_v28, 5.0  ;;  %642 = vpow2.f32 %v455_v31 }
 0x2b1   :  { %v480_v30 = vsel %vm79_vm1, %v502_v29, 0.0  ;;  %v457_v3 = vmul.f32 1.442695, %v502_v29 }
 0x2b2   :  { %481 = vadd.xlane.f32.xlu0 %v480_v30 }
 0x2b3   :  { %644 = vpow2.f32 %v457_v3 }
 0x2b9   :  { %v643_v32 = vpop.eup %642 }
 0x2ba   :  { %v459_v33 = vmul.f32 %v643_v32, %v748_v5 }
 0x2bd   :  { %v645_v34 = vpop.eup %644 }
 0x2be   :  { %v460_v38 = vmul.f32 %v645_v34, %v758_v8 }
 0x31b   :  { %v464_v35 = vpop.permute.xlu1 %463 }
 0x31c   :  { %v469_v36 = vadd.f32 %v464_v35, %v459_v33 }
 0x31e   :  { %v471_v37 = vmul.f32 %v469_v36, %v447_v18 }
 0x31f   :  { %v466_v39 = vpop.permute.xlu1 %465 }
 0x320   :  { %v473_v40 = vadd.f32 %v471_v37, %v765_v20  ;;  %v470_v41 = vadd.f32 %v466_v39, %v460_v38 }
 0x322   :  { %475 = vst.msk [vmem:[%s912_s8] sm:$0xff] %vm79_vm1, %v473_v40  ;;  %v472_v42 = vmul.f32 %v470_v41, %v447_v18 }
 0x324   :  { %v474_v43 = vadd.f32 %v472_v42, %v770_v25 }
 0x326   :  { %476 = vst.msk [vmem:[%s912_s8 + $0x8] sm:$0xff] %vm79_vm1, %v474_v43 }
 0x33b   :  { %v479_v5 = vpop.xlane.xlu0 %478 }
 0x33c   :  { %484 = vst.msk [vmem:[%s913_s9] sm:$0xff] %vm483_vm2, %v479_v5 }
 0x33f   :  { %v482_v8 = vpop.xlane.xlu0 %481 }
 0x340   :  { %485 = vst.msk [vmem:[%s913_s9 + $0x8] sm:$0xff] %vm483_vm2, %v482_v8 }
 0x341   :  { %494 = vsyncpa [#allocation3], 1 }

</bundles_post_ra>
